<compile_context>
chip_gen: v6e
topology: v6e:2x2x1
jax: 0.10.0
libtpu: 0.0.40
codegen_flags: <defaults>
</compile_context>

<pallas_src>
import jax
import jax.numpy as jnp
from jax.experimental import pallas as pl
from jax.experimental.pallas import tpu as pltpu


def _pick_tile(total, target, multiple):
    """Largest tile <= target that is a multiple of `multiple` and divides `total`;
    falls back to the full extent (full dims are exempt from the (8,128) rule)."""
    if total <= target:
        return total
    hi = (min(target, total) // multiple) * multiple
    for cand in range(hi, 0, -multiple):
        if total % cand == 0:
            return cand
    return total


def _linear_predictor_kernel(pf_ref, imf_ref, wlt_ref, wlast_ref,
                             bcol_ref, blast_ref, o_ref, weff_ref, beff_ref):
    obj_tile = pl.program_id(2)

    # w_eff / b_eff are shared by every object of this (batch, pixel-tile): compute them
    # once on the first inner (object) iteration, keep in VMEM scratch for the sweep.
    @pl.when(obj_tile == 0)
    def _init_effective_params():
        imf = imf_ref[...].astype(jnp.float32)                 # (Cim, Pt)
        weff_ref[...] = (
            jnp.dot(wlt_ref[...], imf, preferred_element_type=jnp.float32)
            + wlast_ref[...])                                  # (Cin, Pt)
        beff_ref[...] = (
            jnp.sum(imf * bcol_ref[...], axis=0, keepdims=True)
            + blast_ref[...])                                  # (1, Pt)

    pf = pf_ref[...]                                           # (To, Cin, Pt)
    # Pure VPU multiply + channel reduce per object block (f32 accumulation).
    acc = jnp.sum(pf * weff_ref[...], axis=1)                  # (To, Pt), f32
    o_ref[...] = (acc + beff_ref[...]).astype(o_ref.dtype)


def linear_predictor(im_feat, pred_feat, weight, bias):
    B, N, Cin, H, W = pred_feat.shape
    Bi, Cim, Hi, Wi = im_feat.shape
    Kp1 = weight.shape[0]
    K = Kp1 - 1
    assert Bi == B and Hi == H and Wi == W
    assert Cim == K, "im_feat channels must equal pred_dim"
    P = H * W

    # Large HBM streams keep their native dtype (no forced f32 materialization).
    pf = pred_feat.reshape(B, N, Cin, P)
    imf = im_feat.reshape(B, Cim, P)

    # Tiny projection params, pre-split so the bias-producing row stays out of the matmul.
    w2d = weight.reshape(Kp1, Cin).astype(jnp.float32)
    wlt = jnp.transpose(w2d[:K, :])            # (Cin, K)
    wlast = w2d[K, :].reshape(Cin, 1)          # (Cin, 1)
    bvec = bias.reshape(Kp1).astype(jnp.float32)
    bcol = bvec[:K].reshape(K, 1)              # (K, 1)
    blast = bvec[K].reshape(1, 1)              # (1, 1)

    out_dtype = jnp.result_type(im_feat.dtype, pred_feat.dtype)
    itemsize = jnp.dtype(pf.dtype).itemsize

    # Tile sizes: target ~2 MiB pred_feat blocks, pixel tile a multiple of 128 lanes,
    # object tile a multiple of 8 sublanes (falls back to full extents for small dims).
    blk_bytes = 2 * 1024 * 1024
    pt_target = max(128, min(4096, (blk_bytes // (8 * Cin * itemsize)) // 128 * 128))
    Pt = _pick_tile(P, pt_target, 128)
    to_target = max(8, (blk_bytes // max(1, Cin * Pt * itemsize)) // 8 * 8)
    To = _pick_tile(N, to_target, 8)
    n_pt = P // Pt
    n_ot = N // To

    out = pl.pallas_call(
        _linear_predictor_kernel,
        out_shape=jax.ShapeDtypeStruct((B, N, P), out_dtype),
        grid_spec=pltpu.PrefetchScalarGridSpec(
            num_scalar_prefetch=0,
            # Object axis innermost: the w_eff/b_eff scratch carries across it and the
            # shared im_feat block index stays constant (no refetch across objects).
            grid=(B, n_pt, n_ot),
            in_specs=[
                pl.BlockSpec((None, To, Cin, Pt), lambda b, p, o: (b, o, 0, p)),
                pl.BlockSpec((None, Cim, Pt), lambda b, p, o: (b, 0, p)),
                pl.BlockSpec((Cin, K), lambda b, p, o: (0, 0)),
                pl.BlockSpec((Cin, 1), lambda b, p, o: (0, 0)),
                pl.BlockSpec((K, 1), lambda b, p, o: (0, 0)),
                pl.BlockSpec((1, 1), lambda b, p, o: (0, 0)),
            ],
            out_specs=pl.BlockSpec((None, To, Pt), lambda b, p, o: (b, o, p)),
            scratch_shapes=[
                pltpu.VMEM((Cin, Pt), jnp.float32),    # w_eff
                pltpu.VMEM((1, Pt), jnp.float32),      # b_eff
            ],
        ),
        compiler_params=pltpu.CompilerParams(
            dimension_semantics=("parallel", "parallel", "arbitrary"),
            vmem_limit_bytes=48 * 1024 * 1024,
        ),
    )(pf, imf, wlt, wlast, bcol, blast)

    return out.reshape(B, N, 1, H, W)


def linear_predictor_ref(im_feat, pred_feat, weight, bias):
    """Pure-JAX reference mirroring the PyTorch forward."""
    Kp1, Cin = weight.shape[0], weight.shape[1]
    w = weight.reshape(Kp1, Cin)
    params = jnp.einsum('kc,bnchw->bnkhw', w, pred_feat) \
        + bias.reshape(1, 1, Kp1, 1, 1)
    x = (im_feat[:, None] * params[:, :, :-1]).sum(axis=2, keepdims=True) \
        + params[:, :, -1:]
    return x


if __name__ == "__main__":
    B, N, H, W = 2, 8, 16, 16
    in_dim, pred_dim = 32, 16

    key = jax.random.PRNGKey(0)
    k_im, k_pf, k_w, k_b = jax.random.split(key, 4)

    im_feat = jax.random.normal(k_im, (B, pred_dim, H, W), jnp.float32)
    pred_feat = jax.random.normal(k_pf, (B, N, in_dim, H, W), jnp.float32)

    # Deterministic Conv2d(in_dim, pred_dim+1, kernel_size=1) params,
    # PyTorch-default-style uniform(-1/sqrt(fan_in), 1/sqrt(fan_in)).
    bound = 1.0 / (in_dim ** 0.5)
    weight = jax.random.uniform(k_w, (pred_dim + 1, in_dim, 1, 1),
                                jnp.float32, -bound, bound)
    bias = jax.random.uniform(k_b, (pred_dim + 1,), jnp.float32, -bound, bound)

    fwd = jax.jit(linear_predictor)
    out = jax.block_until_ready(fwd(im_feat, pred_feat, weight, bias))

    ref = linear_predictor_ref(im_feat, pred_feat, weight, bias)
    assert out.shape == (B, N, 1, H, W)
    assert jnp.allclose(out, ref, rtol=1e-3, atol=1e-3), "mismatch vs reference"

    print("KERNEL_OK")
</pallas_src>

<mosaic_0001>
module attributes {stable_mosaic.version = 11 : i64} {
  func.func @_linear_predictor_kernel(%arg0: i32, %arg1: i32, %arg2: i32, %arg3: memref<1x8x32x256xf32, #tpu.memory_space<vmem>>, %arg4: memref<1x16x256xf32, #tpu.memory_space<vmem>>, %arg5: memref<32x16xf32, #tpu.memory_space<vmem>>, %arg6: memref<32x1xf32, #tpu.memory_space<vmem>>, %arg7: memref<16x1xf32, #tpu.memory_space<vmem>>, %arg8: memref<1x1xf32, #tpu.memory_space<vmem>>, %arg9: memref<1x8x256xf32, #tpu.memory_space<vmem>>, %arg10: memref<32x256xf32, #tpu.memory_space<vmem>>, %arg11: memref<1x256xf32, #tpu.memory_space<vmem>>) attributes {dimension_semantics = [#tpu.dimension_semantics<parallel>, #tpu.dimension_semantics<parallel>, #tpu.dimension_semantics<arbitrary>], iteration_bounds = array<i64: 2, 1, 1>, scalar_prefetch = 0 : i64, scratch_operands = 2 : i64, tpu.core_type = #tpu.core_type<tc>, window_params = [{transform_indices = @transform_0, window_bounds = array<i64: 1, 8, 32, 256>}, {transform_indices = @transform_1, window_bounds = array<i64: 1, 16, 256>}, {pipeline_mode = #tpu.pipeline_mode<synchronous>, transform_indices = @transform_2, window_bounds = array<i64: 32, 16>}, {pipeline_mode = #tpu.pipeline_mode<synchronous>, transform_indices = @transform_3, window_bounds = array<i64: 32, 1>}, {pipeline_mode = #tpu.pipeline_mode<synchronous>, transform_indices = @transform_4, window_bounds = array<i64: 16, 1>}, {pipeline_mode = #tpu.pipeline_mode<synchronous>, transform_indices = @transform_5, window_bounds = array<i64: 1, 1>}, {transform_indices = @transform_6, window_bounds = array<i64: 1, 8, 256>}]} {
    %c0_i32 = arith.constant 0 : i32
    %0 = arith.cmpi eq, %arg2, %c0_i32 : i32
    %1 = arith.extui %0 : i1 to i32
    %c0_i32_0 = arith.constant 0 : i32
    %2 = arith.cmpi ne, %1, %c0_i32_0 : i32
    scf.if %2 {
      %c0_11 = arith.constant 0 : index
      %c0_12 = arith.constant 0 : index
      %c0_13 = arith.constant 0 : index
      %16 = vector.load %arg4[%c0_11, %c0_12, %c0_13] : memref<1x16x256xf32, #tpu.memory_space<vmem>>, vector<1x16x256xf32>
      %17 = vector.shape_cast %16 : vector<1x16x256xf32> to vector<16x256xf32>
      %c0_14 = arith.constant 0 : index
      %c0_15 = arith.constant 0 : index
      %18 = vector.load %arg5[%c0_14, %c0_15] : memref<32x16xf32, #tpu.memory_space<vmem>>, vector<32x16xf32>
      %cst_16 = arith.constant dense<0.000000e+00> : vector<32x256xf32>
      %19 = tpu.matmul %18, %17, %cst_16 {dimension_numbers = #tpu.dot_dimension_numbers<[1], [0], [0], [1], [0, 0, 1, 1], [], []>} : vector<32x16xf32>, vector<16x256xf32>, vector<32x256xf32> -> vector<32x256xf32>
      %c0_17 = arith.constant 0 : index
      %c0_18 = arith.constant 0 : index
      %20 = vector.load %arg6[%c0_17, %c0_18] : memref<32x1xf32, #tpu.memory_space<vmem>>, vector<32x1xf32>
      %21 = vector.broadcast %20 : vector<32x1xf32> to vector<32x256xf32>
      %22 = arith.addf %19, %21 : vector<32x256xf32>
      %c0_19 = arith.constant 0 : index
      %c0_20 = arith.constant 0 : index
      %23 = vector.load %arg10[%c0_19, %c0_20] : memref<32x256xf32, #tpu.memory_space<vmem>>, vector<32x256xf32>
      tpu.vector_store %arg10[%c0_19, %c0_20], %22 {strides = array<i32>} : memref<32x256xf32, #tpu.memory_space<vmem>>, vector<32x256xf32>,
      %c0_21 = arith.constant 0 : index
      %c0_22 = arith.constant 0 : index
      %24 = vector.load %arg7[%c0_21, %c0_22] : memref<16x1xf32, #tpu.memory_space<vmem>>, vector<16x1xf32>
      %25 = vector.broadcast %24 : vector<16x1xf32> to vector<16x256xf32>
      %26 = arith.mulf %17, %25 : vector<16x256xf32>
      %cst_23 = arith.constant dense<0.000000e+00> : vector<256xf32>
      %27 = vector.multi_reduction <add>, %26, %cst_23 [0] : vector<16x256xf32> to vector<256xf32>
      %28 = vector.shape_cast %27 : vector<256xf32> to vector<1x256xf32>
      %c0_24 = arith.constant 0 : index
      %c0_25 = arith.constant 0 : index
      %29 = vector.load %arg8[%c0_24, %c0_25] : memref<1x1xf32, #tpu.memory_space<vmem>>, vector<1x1xf32>
      %30 = vector.broadcast %29 : vector<1x1xf32> to vector<1x256xf32>
      %31 = arith.addf %28, %30 : vector<1x256xf32>
      %c0_26 = arith.constant 0 : index
      %c0_27 = arith.constant 0 : index
      %32 = vector.load %arg11[%c0_26, %c0_27] : memref<1x256xf32, #tpu.memory_space<vmem>>, vector<1x256xf32>
      tpu.vector_store %arg11[%c0_26, %c0_27], %31 {strides = array<i32>} : memref<1x256xf32, #tpu.memory_space<vmem>>, vector<1x256xf32>,
    } else {
    }
    %c0 = arith.constant 0 : index
    %c0_1 = arith.constant 0 : index
    %c0_2 = arith.constant 0 : index
    %c0_3 = arith.constant 0 : index
    %3 = vector.load %arg3[%c0, %c0_1, %c0_2, %c0_3] : memref<1x8x32x256xf32, #tpu.memory_space<vmem>>, vector<1x8x32x256xf32>
    %4 = vector.shape_cast %3 : vector<1x8x32x256xf32> to vector<8x32x256xf32>
    %c0_4 = arith.constant 0 : index
    %c0_5 = arith.constant 0 : index
    %5 = vector.load %arg10[%c0_4, %c0_5] : memref<32x256xf32, #tpu.memory_space<vmem>>, vector<32x256xf32>
    %6 = vector.shape_cast %5 : vector<32x256xf32> to vector<1x32x256xf32>
    %7 = vector.broadcast %6 : vector<1x32x256xf32> to vector<8x32x256xf32>
    %8 = arith.mulf %4, %7 : vector<8x32x256xf32>
    %cst = arith.constant dense<0.000000e+00> : vector<8x256xf32>
    %9 = vector.multi_reduction <add>, %8, %cst [1] : vector<8x32x256xf32> to vector<8x256xf32>
    %c0_6 = arith.constant 0 : index
    %c0_7 = arith.constant 0 : index
    %10 = vector.load %arg11[%c0_6, %c0_7] : memref<1x256xf32, #tpu.memory_space<vmem>>, vector<1x256xf32>
    %11 = vector.broadcast %10 : vector<1x256xf32> to vector<8x256xf32>
    %12 = arith.addf %9, %11 : vector<8x256xf32>
    %c0_8 = arith.constant 0 : index
    %c0_9 = arith.constant 0 : index
    %c0_10 = arith.constant 0 : index
    %13 = vector.load %arg9[%c0_8, %c0_9, %c0_10] : memref<1x8x256xf32, #tpu.memory_space<vmem>>, vector<1x8x256xf32>
    %14 = vector.shape_cast %13 : vector<1x8x256xf32> to vector<8x256xf32>
    %15 = vector.shape_cast %12 : vector<8x256xf32> to vector<1x8x256xf32>
    tpu.vector_store %arg9[%c0_8, %c0_9, %c0_10], %15 {strides = array<i32>} : memref<1x8x256xf32, #tpu.memory_space<vmem>>, vector<1x8x256xf32>,
    return
  }
  func.func @transform_0(%arg0: i32, %arg1: i32, %arg2: i32) -> (i32, i32, i32, i32) {
    %c0_i32 = arith.constant 0 : i32
    %c0_i32_0 = arith.constant 0 : i32
    return %arg0, %arg2, %c0_i32, %arg1 : i32, i32, i32, i32
  }
  func.func @transform_1(%arg0: i32, %arg1: i32, %arg2: i32) -> (i32, i32, i32) {
    %c0_i32 = arith.constant 0 : i32
    %c0_i32_0 = arith.constant 0 : i32
    return %arg0, %c0_i32, %arg1 : i32, i32, i32
  }
  func.func @transform_2(%arg0: i32, %arg1: i32, %arg2: i32) -> (i32, i32) {
    %c0_i32 = arith.constant 0 : i32
    %c0_i32_0 = arith.constant 0 : i32
    %c0_i32_1 = arith.constant 0 : i32
    return %c0_i32, %c0_i32_0 : i32, i32
  }
  func.func @transform_3(%arg0: i32, %arg1: i32, %arg2: i32) -> (i32, i32) {
    %c0_i32 = arith.constant 0 : i32
    %c0_i32_0 = arith.constant 0 : i32
    %c0_i32_1 = arith.constant 0 : i32
    return %c0_i32, %c0_i32_0 : i32, i32
  }
  func.func @transform_4(%arg0: i32, %arg1: i32, %arg2: i32) -> (i32, i32) {
    %c0_i32 = arith.constant 0 : i32
    %c0_i32_0 = arith.constant 0 : i32
    %c0_i32_1 = arith.constant 0 : i32
    return %c0_i32, %c0_i32_0 : i32, i32
  }
  func.func @transform_5(%arg0: i32, %arg1: i32, %arg2: i32) -> (i32, i32) {
    %c0_i32 = arith.constant 0 : i32
    %c0_i32_0 = arith.constant 0 : i32
    %c0_i32_1 = arith.constant 0 : i32
    return %c0_i32, %c0_i32_0 : i32, i32
  }
  func.func @transform_6(%arg0: i32, %arg1: i32, %arg2: i32) -> (i32, i32, i32) {
    %c0_i32 = arith.constant 0 : i32
    return %arg0, %arg2, %arg1 : i32, i32, i32
  }
}

</mosaic_0001>

<bundles_post_ra>
// kernel: linear_predictor.1
= control target key start
LH: loop header
LB: loop body
LE: loop exit
PB: predicated region body
PF: predicated region fallthrough
CT: control target
= control target key end

     0   :  { %s1187_s23 = smov 0   ;;  %s1189_s24 = smov 0   ;;  %s1490_s0 = inlined_call_operand.vmem [shape: f32[2,8,32,256], index: 0, kind: input, shape index: {}]   ;;  %s1491_s1 = inlined_call_operand.vmem [shape: f32[2,16,256], index: 1, kind: input, shape index: {}]   ;;  %s1492_s2 = inlined_call_operand.vmem [shape: f32[32,16], index: 2, kind: input, shape index: {}]   ;;  %s1493_s3 = inlined_call_operand.vmem [shape: f32[32,1], index: 3, kind: input, shape index: {}]   ;;  %s1494_s4 = inlined_call_operand.vmem [shape: f32[16,1], index: 4, kind: input, shape index: {}]   ;;  %s1495_s5 = inlined_call_operand.<no memory space> [shape: f32[1,1], index: 5, kind: input, shape index: {}]   ;;  %s1496_s6 = inlined_call_operand.vmem [shape: f32[2,8,256], index: 6, kind: output, shape index: {}]  }
   0x1   :  { %v11_v0 = vstv %s1495_s5  ;;  %s1191_s25 = smov 0  }
   0x2   :  { %12 = vst [vmem:[#allocation4] sm:$0x1] %v11_v0 }
   0x3 LB: > { %s37_s5 = sadd.s32 1, %s1140_s24  ;;  %p1073_p0 = scmp.ge.s32.totalorder %s1144_s25, 1  ;;  %s1144_s25 = sphi %s1191_s25, %s18_s25   ;;  %s1140_s24 = sphi %s1189_s24, %s1498_s24   ;;  %s1136_s23 = sphi %s1187_s23, %s1497_s23  }
   0x4   : > { %p39_p1 = scmp.ge.s32.totalorder %s37_s5, 2  ;;  %p269_p2 = scmp.lt.s32.totalorder %s1144_s25, 3 }
   0x6   : > { %s1500_s5 = smov (%p39_p1, %s37_s5), 0  ;;  %p270_p3 = pnand %p1073_p0, %p269_p2 }
   0x7   : > { %p327_p4 = scmp.lt.s32.totalorder (!%p270_p3), %s1136_s23, 1 }
   0x8   : > { %273 = sbr.rel (%p270_p3) target bundleno = 287 (0x11f), region = 44 }
   0xd   : > { %v1146_v1 = vmov 0.0   ;;  %v511_v2 = vld [vmem:[%s1494_s4] sm:$0xff]  ;;  %s1502_s23 = smov (!%p327_p4, %s1136_s23), 1  ;;  %v1147_v3 = vmov 0   ;;  %vm401_vm0 = vcmask 130048   ;;  %v375_v10 = vld [vmem:[%s1492_s2 + $0x10] sm:$0xff]  ;;  %v547_v25 = vlaneseq }
   0xe   : > { %478 = vmatprep.mubr.f32.mxu0 %v1146_v1  ;;  %490 = vmatprep.mubr.f32.mxu1 %v1146_v1  ;;  %v377_v4 = vld [vmem:[%s1493_s3] sm:$0xff]  ;;  %s1087_s30 = sshll.u32 %s1502_s23, 5  ;;  %v512_v11 = vld [vmem:[%s1494_s4 + $0x8] sm:$0xff]  ;;  %v376_v14 = vld [vmem:[%s1492_s2 + $0x18] sm:$0xff]  ;;  %v1148_v37 = vmov 1966171168  }
   0xf   : > { %1120 = vset.pattern.permute.xlu0 %v1147_v3  ;;  %1121 = vset.pattern.permute.xlu1 %v1147_v3  ;;  %s349_s9 = scalar_lea.vmem %s1491_s1, %s1087_s30  ;;  %v373_v9 = vld [vmem:[%s1492_s2] sm:$0xff]  ;;  %v378_v12 = vld [vmem:[%s1493_s3 + $0x8] sm:$0xff]  ;;  %v379_v15 = vld [vmem:[%s1493_s3 + $0x10] sm:$0xff]  ;;  %v548_v31 = vshrl.u32 %v547_v25, 7  ;;  %v557_v38 = vunpack.c.l.s4 %v1148_v37  ;;  %vm573_vm1 = vcmp.lt.s32.totalorder %v547_v25, 256  ;;  %s1086_s29 = sshll.u32 %s1502_s23, 9 }
  0x10   : > { %515 = vperm.xlu0 %1120, %v511_v2   ;;  %383 = vperm.xlu1 %1121, %v377_v4   ;;  %v372_v5 = vld [vmem:[%s349_s9 + $0x18] sm:$0xff]  ;;  %v371_v6 = vld [vmem:[%s349_s9 + $0x10] sm:$0xff]  ;;  %v370_v7 = vld [vmem:[%s349_s9 + $0x8] sm:$0xff]  ;;  %s1253_s8 = scalar_lea.vmem %s1490_s0, %s1086_s29  ;;  %vm901_vm2 = vcmask 1041409   ;;  %vm904_vm3 = vcmask 1042434   ;;  %vm907_vm4 = vcmask 1043459  }
  0x11   : > { %442 = vmatprep.subr.mxu0 %v372_v5  ;;  %1089 = vmatprep.subr.mxu1 %v372_v5  ;;  %v369_v8 = vld [vmem:[%s349_s9] sm:$0xff]  ;;  %v374_v13 = vld [vmem:[%s1492_s2 + $0x8] sm:$0xff]  ;;  %v380_v17 = vld [vmem:[%s1493_s3 + $0x18] sm:$0xff]  ;;  %v549_v36 = vsub.s32 0, %v548_v31  ;;  %v558_v42 = vunpack.c.0.s8 %v557_v38  ;;  %v864_v57 = vsub.s32 1, %v548_v31  ;;  %vm910_vm5 = vcmask 1044484  }
  0x12   : > { %443 = vmatpush1.msra.mxu0 %v371_v6  ;;  %1091 = vmatpush1.msra.mxu1 %v371_v6  ;;  %v541_v16 = vld [vmem:[#allocation4] sm:$0x1]  ;;  %v585_v25 = vld [vmem:[%s1253_s8 + $0x48] sm:$0xff]  ;;  %vm913_vm6 = vcmask 1045509   ;;  %vm916_vm7 = vcmask 1046534   ;;  %vm919_vm8 = vcmask 1047559  }
  0x13   : > { %444 = vmatprep.subr.mxu0 %v370_v7  ;;  %1090 = vmatprep.subr.mxu1 %v370_v7  ;;  %v561_v48 = vsub.s32 %v558_v42, %v548_v31  ;;  %v576_v54 = vld [vmem:[%s1253_s8] sm:$0xff]  ;;  %v633_v42 = vld [vmem:[%s1253_s8 + $0x1c8] sm:$0xff]  ;;  %s1088_s9 = sshll.u32 %s1502_s23, 4 }
  0x14   : > { %445 = vmatpush1.msra.mxu0 %v369_v8  ;;  %1092 = vmatpush1.msra.mxu1 %v369_v8  ;;  %v584_v55 = vld [vmem:[%s1253_s8 + $0x40] sm:$0xff]  ;;  %s1438_s11 = scalar_lea.vmem %s1496_s6, %s1088_s9 }
  0x15   : > { %1080 = vmatmul.mubr.msk.f32.vlgmr.msra.gmra.mxu0 %vm401_vm0, %v373_v9  ;;  %1082 = vmatmul.mubr.msk.f32.vlgmr.msra.gmra.mxu1 %vm401_vm0, %v375_v10  ;;  %v592_v58 = vld [vmem:[%s1253_s8 + $0x80] sm:$0xff] }
  0x16   : > { %484 = vmatprep.mubr.f32.mxu0 %v1146_v1  ;;  %496 = vmatprep.mubr.f32.mxu1 %v1146_v1  ;;  %v600_v59 = vld [vmem:[%s1253_s8 + $0xc0] sm:$0xff] }
  0x17   : > { %520 = vperm.xlu0 %1120, %v512_v11   ;;  %388 = vperm.xlu1 %1121, %v378_v12   ;;  %v608_v60 = vld [vmem:[%s1253_s8 + $0x100] sm:$0xff] }
  0x18   : > { %v616_v63 = vld [vmem:[%s1253_s8 + $0x140] sm:$0xff] }
  0x19   : > { %1081 = vmatmul.mubr.msk.f32.gmra.mxu0 %vm401_vm0, %v374_v13  ;;  %1083 = vmatmul.mubr.msk.f32.gmra.mxu1 %vm401_vm0, %v376_v14  ;;  %v624_v0 = vld [vmem:[%s1253_s8 + $0x180] sm:$0xff] }
  0x1a   : > { %v632_v3 = vld [vmem:[%s1253_s8 + $0x1c0] sm:$0xff] }
  0x1b   : > { %393 = vperm.xlu0 %1120, %v379_v15   ;;  %544 = vperm.xlu1 %1121, %v541_v16   ;;  %v612_v9 = vld [vmem:[%s1253_s8 + $0x120] sm:$0xff] }
  0x1c   : > { %v620_v16 = vld [vmem:[%s1253_s8 + $0x160] sm:$0xff] }
  0x1f   : > { %398 = vperm.xlu0 %1120, %v380_v17   ;;  %v628_v17 = vld [vmem:[%s1253_s8 + $0x1a0] sm:$0xff] }
  0x8b   : > { %v516_v18 = vpop.permute.xlu0 %515  ;;  %v1245_v19 = vpop.permute.xlu1 %383 }
  0x8c   : > { %v523_v20 = vmul.f32 %v516_v18, %v369_v8  ;;  %v524_v21 = vmul.f32 %v516_v18, %v370_v7  ;;  %v596_v7 = vld [vmem:[%s1253_s8 + $0xa0] sm:$0xff] }
  0x8d   : > { %v604_v8 = vld [vmem:[%s1253_s8 + $0xe0] sm:$0xff] }
  0x8e   : > { %v636_v18 = vld [vmem:[%s1253_s8 + $0x1e0] sm:$0xff] }
  0x92   : > { %v521_v22 = vpop.permute.xlu0 %520  ;;  %v1247_v28 = vpop.permute.xlu1 %388 }
  0x93   : > { %v525_v23 = vmul.f32 %v521_v22, %v371_v6  ;;  %v526_v24 = vmul.f32 %v521_v22, %v372_v5  ;;  %v580_v5 = vld [vmem:[%s1253_s8 + $0x20] sm:$0xff] }
  0x94   : > { %v588_v6 = vld [vmem:[%s1253_s8 + $0x60] sm:$0xff] }
  0x95   : > { %v527_v26 = vadd.f32 %v525_v23, %v523_v20  ;;  %v534_v27 = vadd.f32 %v526_v24, %v524_v21  ;;  %v577_v24 = vld [vmem:[%s1253_s8 + $0x8] sm:$0xff] }
  0x96   : > { %v545_v39 = vpop.permute.xlu1 %544  ;;  %v394_v56 = vpop.permute.xlu0 %393 }
  0x97   : > { %v528_v29 = vrot.slane %v527_v26, 4  ;;  %v535_v30 = vrot.slane %v534_v27, 4  ;;  %v550_v45 = vrot.slane %v545_v39, %v549_v36 }
  0x99   : > { %v529_v32 = vadd.f32 %v528_v29, %v527_v26  ;;  %v536_v33 = vadd.f32 %v535_v30, %v534_v27  ;;  %v593_v26 = vld [vmem:[%s1253_s8 + $0x88] sm:$0xff] }
  0x9b   : > { %v530_v34 = vrot.slane %v529_v32, 2  ;;  %v537_v35 = vrot.slane %v536_v33, 2 }
  0x9d   : > { %v531_v40 = vadd.f32 %v530_v34, %v529_v32  ;;  %v538_v41 = vadd.f32 %v537_v35, %v536_v33  ;;  %v601_v34 = vld [vmem:[%s1253_s8 + $0xc8] sm:$0xff] }
  0x9e   : > { %v609_v35 = vld [vmem:[%s1253_s8 + $0x108] sm:$0xff] }
  0x9f   : > { %v532_v43 = vrot.slane %v531_v40, 1  ;;  %v539_v44 = vrot.slane %v538_v41, 1 }
  0xa1   : > { %v533_v46 = vadd.f32 %v532_v43, %v531_v40  ;;  %v540_v47 = vadd.f32 %v539_v44, %v538_v41  ;;  %v625_v41 = vld [vmem:[%s1253_s8 + $0x188] sm:$0xff] }
  0xa2   : > { %v581_v43 = vld [vmem:[%s1253_s8 + $0x28] sm:$0xff] }
  0xa3   : > { %v551_v49 = vadd.f32 %v550_v45, %v533_v46  ;;  %v552_v50 = vadd.f32 %v550_v45, %v540_v47  ;;  %v399_v46 = vpop.permute.xlu0 %398 }
  0xa5   : > { %v555_v51 = vcombine.low %v551_v49, %v552_v50 }
  0xa7   : > { %v562_v52 = vrot.slane %v555_v51, %v561_v48  ;;  %v589_v51 = vld [vmem:[%s1253_s8 + $0x68] sm:$0xff] }
  0xa9   : > { %v569_v53 = vrot.slane %v562_v52, %v561_v48  ;;  %v597_v52 = vld [vmem:[%s1253_s8 + $0xa8] sm:$0xff] }
  0xab   : > { %575 = vst.msk [vmem:[#allocation3] sm:$0x3] %vm573_vm1, %v569_v53  ;;  %v605_v53 = vld [vmem:[%s1253_s8 + $0xe8] sm:$0xff] }
  0xb2   : > { %v856_v61 = vld [vmem:[#allocation3] sm:$0x3] }
  0xb3   : > { %v1269_v12 = vrot.slane %v856_v61, %v549_v36  ;;  %v1271_v13 = vrot.slane %v856_v61, %v864_v57  ;;  %v617_v36 = vld [vmem:[%s1253_s8 + $0x148] sm:$0xff] }
  0xb4   : > { %v629_v57 = vld [vmem:[%s1253_s8 + $0x1a8] sm:$0xff] }
  0xd5   : > { %v480_v62 = vpop.f32.mrf.mxu0  ;;  %v492_v1 = vpop.f32.mrf.mxu1 }
  0xd6   : > { %v481_v2 = vadd.f32 %v480_v62, %v1245_v19  ;;  %v493_v4 = vadd.f32 %v492_v1, %v394_v56  ;;  %v578_v1 = vld [vmem:[%s1253_s8 + $0x10] sm:$0xff] }
  0xd7   : > { %v482_v10 = vpop.f32.mrf.mxu0  ;;  %v494_v11 = vpop.f32.mrf.mxu1 }
  0xd8   : > { %v1273_v14 = vmul.f32 %v576_v54, %v481_v2  ;;  %v1275_v15 = vmul.f32 %v584_v55, %v481_v2  ;;  %v1280_v20 = vmul.f32 %v592_v58, %v481_v2  ;;  %v1282_v21 = vmul.f32 %v600_v59, %v481_v2  ;;  %v613_v54 = vld [vmem:[%s1253_s8 + $0x128] sm:$0xff] }
  0xd9   : > { %v1284_v22 = vmul.f32 %v608_v60, %v481_v2  ;;  %v1286_v23 = vmul.f32 %v616_v63, %v481_v2  ;;  %v486_v27 = vpop.f32.mrf.mxu0  ;;  %v498_v29 = vpop.f32.mrf.mxu1  ;;  %v1291_v30 = vmul.f32 %v624_v0, %v481_v2  ;;  %v1293_v31 = vmul.f32 %v632_v3, %v481_v2  ;;  %v621_v55 = vld [vmem:[%s1253_s8 + $0x168] sm:$0xff]  ;;  %v586_v2 = vld [vmem:[%s1253_s8 + $0x50] sm:$0xff] }
  0xda   : > { %v1295_v32 = vmul.f32 %v580_v5, %v493_v4  ;;  %v1297_v33 = vmul.f32 %v588_v6, %v493_v4  ;;  %v1302_v37 = vmul.f32 %v596_v7, %v493_v4  ;;  %v1304_v38 = vmul.f32 %v604_v8, %v493_v4  ;;  %v637_v0 = vld [vmem:[%s1253_s8 + $0x1e8] sm:$0xff]  ;;  %v594_v6 = vld [vmem:[%s1253_s8 + $0x90] sm:$0xff] }
  0xdb   : > { %v1306_v39 = vmul.f32 %v612_v9, %v493_v4  ;;  %v1308_v40 = vmul.f32 %v620_v16, %v493_v4  ;;  %v488_v44 = vpop.f32.mrf.mxu0  ;;  %v500_v45 = vpop.f32.mrf.mxu1  ;;  %v1313_v47 = vmul.f32 %v628_v17, %v493_v4  ;;  %v1315_v48 = vmul.f32 %v636_v18, %v493_v4  ;;  %v602_v7 = vld [vmem:[%s1253_s8 + $0xd0] sm:$0xff] }
  0xdc   : > { %v483_v49 = vadd.f32 %v482_v10, %v1245_v19  ;;  %v495_v50 = vadd.f32 %v494_v11, %v394_v56  ;;  %v487_v58 = vadd.f32 %v486_v27, %v1247_v28  ;;  %v499_v59 = vadd.f32 %v498_v29, %v399_v46  ;;  %v610_v8 = vld [vmem:[%s1253_s8 + $0x110] sm:$0xff] }
  0xdd   : > { %v1326_v60 = vadd.f32 %v488_v44, %v1247_v28  ;;  %v1328_v19 = vadd.f32 %v500_v45, %v399_v46  ;;  %v618_v17 = vld [vmem:[%s1253_s8 + $0x150] sm:$0xff] }
  0xde   : > { %v1330_v56 = vmul.f32 %v577_v24, %v483_v49  ;;  %v1332_v61 = vmul.f32 %v585_v25, %v483_v49  ;;  %v1334_v62 = vmul.f32 %v593_v26, %v483_v49  ;;  %v1336_v63 = vmul.f32 %v601_v34, %v483_v49  ;;  %v626_v18 = vld [vmem:[%s1253_s8 + $0x190] sm:$0xff] }
  0xdf   : > { %v1341_v3 = vmul.f32 %v609_v35, %v483_v49  ;;  %v1343_v28 = vmul.f32 %v617_v36, %v483_v49  ;;  %v1345_v4 = vmul.f32 %v625_v41, %v483_v49  ;;  %v1347_v5 = vmul.f32 %v633_v42, %v483_v49  ;;  %v634_v24 = vld [vmem:[%s1253_s8 + $0x1d0] sm:$0xff] }
  0xe0   : > { %v1352_v9 = vmul.f32 %v581_v43, %v495_v50  ;;  %v1354_v10 = vmul.f32 %v589_v51, %v495_v50  ;;  %v1356_v11 = vmul.f32 %v597_v52, %v495_v50  ;;  %v1358_v16 = vmul.f32 %v605_v53, %v495_v50  ;;  %v582_v42 = vld [vmem:[%s1253_s8 + $0x30] sm:$0xff] }
  0xe1   : > { %v1363_v25 = vmul.f32 %v613_v54, %v495_v50  ;;  %v1365_v26 = vmul.f32 %v621_v55, %v495_v50  ;;  %v1367_v27 = vmul.f32 %v629_v57, %v495_v50  ;;  %v1369_v29 = vmul.f32 %v637_v0, %v495_v50  ;;  %v590_v43 = vld [vmem:[%s1253_s8 + $0x70] sm:$0xff] }
  0xe2   : > { %v650_v34 = vmul.f32 %v578_v1, %v487_v58  ;;  %v658_v35 = vmul.f32 %v586_v2, %v487_v58  ;;  %v666_v36 = vmul.f32 %v594_v6, %v487_v58  ;;  %v674_v41 = vmul.f32 %v602_v7, %v487_v58  ;;  %v598_v51 = vld [vmem:[%s1253_s8 + $0xb0] sm:$0xff] }
  0xe3   : > { %v682_v44 = vmul.f32 %v610_v8, %v487_v58  ;;  %v690_v45 = vmul.f32 %v618_v17, %v487_v58  ;;  %v698_v46 = vmul.f32 %v626_v18, %v487_v58  ;;  %v706_v49 = vmul.f32 %v634_v24, %v487_v58  ;;  %v606_v52 = vld [vmem:[%s1253_s8 + $0xf0] sm:$0xff] }
  0xe4   : > { %v614_v53 = vld [vmem:[%s1253_s8 + $0x130] sm:$0xff]  ;;  %v712_v54 = vadd.f32 %v650_v34, %v1273_v14  ;;  %v730_v50 = vadd.f32 %v658_v35, %v1275_v15  ;;  %v748_v55 = vadd.f32 %v666_v36, %v1280_v20  ;;  %v766_v57 = vadd.f32 %v674_v41, %v1282_v21 }
  0xe5   : > { %v622_v0 = vld [vmem:[%s1253_s8 + $0x170] sm:$0xff]  ;;  %v784_v6 = vadd.f32 %v682_v44, %v1284_v22  ;;  %v802_v7 = vadd.f32 %v690_v45, %v1286_v23  ;;  %v820_v58 = vadd.f32 %v698_v46, %v1291_v30  ;;  %v838_v8 = vadd.f32 %v706_v49, %v1293_v31 }
  0xe6   : > { %v630_v1 = vld [vmem:[%s1253_s8 + $0x1b0] sm:$0xff]  ;;  %v654_v17 = vmul.f32 %v582_v42, %v499_v59  ;;  %v662_v18 = vmul.f32 %v590_v43, %v499_v59  ;;  %v670_v14 = vmul.f32 %v598_v51, %v499_v59  ;;  %v678_v24 = vmul.f32 %v606_v52, %v499_v59 }
  0xe7   : > { %v638_v2 = vld [vmem:[%s1253_s8 + $0x1f0] sm:$0xff]  ;;  %v686_v15 = vmul.f32 %v614_v53, %v499_v59  ;;  %v694_v34 = vmul.f32 %v622_v0, %v499_v59  ;;  %v702_v20 = vmul.f32 %v630_v1, %v499_v59  ;;  %v713_v21 = vadd.f32 %v712_v54, %v1295_v32 }
  0xe8   : > { %v710_v35 = vmul.f32 %v638_v2, %v499_v59  ;;  %v731_v36 = vadd.f32 %v730_v50, %v1297_v33  ;;  %v749_v22 = vadd.f32 %v748_v55, %v1302_v37  ;;  %v767_v23 = vadd.f32 %v766_v57, %v1304_v38 }
  0xe9   : > { %v785_v30 = vadd.f32 %v784_v6, %v1306_v39  ;;  %v803_v31 = vadd.f32 %v802_v7, %v1308_v40  ;;  %v821_v41 = vadd.f32 %v820_v58, %v1313_v47  ;;  %v839_v42 = vadd.f32 %v838_v8, %v1315_v48 }
  0xea   : > { %v714_v43 = vadd.f32 %v713_v21, %v654_v17  ;;  %v732_v44 = vadd.f32 %v731_v36, %v662_v18  ;;  %v750_v45 = vadd.f32 %v749_v22, %v670_v14  ;;  %v768_v59 = vadd.f32 %v767_v23, %v678_v24 }
  0xeb   : > { %v786_v46 = vadd.f32 %v785_v30, %v686_v15  ;;  %v804_v32 = vadd.f32 %v803_v31, %v694_v34  ;;  %v822_v49 = vadd.f32 %v821_v41, %v702_v20  ;;  %v840_v33 = vadd.f32 %v839_v42, %v710_v35 }
  0xec   : > { %v715_v51 = vrot.slane %v714_v43, 4  ;;  %v733_v37 = vrot.slane %v732_v44, 4  ;;  %v751_v52 = vrot.slane %v750_v45, 4  ;;  %v769_v38 = vrot.slane %v768_v59, 4 }
  0xed   : > { %v787_v53 = vrot.slane %v786_v46, 4  ;;  %v805_v39 = vrot.slane %v804_v32, 4  ;;  %v823_v54 = vrot.slane %v822_v49, 4  ;;  %v841_v40 = vrot.slane %v840_v33, 4 }
  0xee   : > { %v716_v50 = vadd.f32 %v715_v51, %v714_v43  ;;  %v734_v47 = vadd.f32 %v733_v37, %v732_v44  ;;  %v752_v55 = vadd.f32 %v751_v52, %v750_v45  ;;  %v770_v48 = vadd.f32 %v769_v38, %v768_v59 }
  0xef   : > { %v788_v57 = vadd.f32 %v787_v53, %v786_v46  ;;  %v806_v0 = vadd.f32 %v805_v39, %v804_v32  ;;  %v824_v1 = vadd.f32 %v823_v54, %v822_v49  ;;  %v842_v2 = vadd.f32 %v841_v40, %v840_v33  ;;  %v579_v53 = vld [vmem:[%s1253_s8 + $0x18] sm:$0xff] }
  0xf0   : > { %v717_v6 = vrot.slane %v716_v50, 2  ;;  %v735_v7 = vrot.slane %v734_v47, 2  ;;  %v753_v58 = vrot.slane %v752_v55, 2  ;;  %v771_v8 = vrot.slane %v770_v48, 2 }
  0xf1   : > { %v789_v17 = vrot.slane %v788_v57, 2  ;;  %v807_v18 = vrot.slane %v806_v0, 2  ;;  %v825_v14 = vrot.slane %v824_v1, 2  ;;  %v843_v24 = vrot.slane %v842_v2, 2 }
  0xf2   : > { %v718_v15 = vadd.f32 %v717_v6, %v716_v50  ;;  %v736_v34 = vadd.f32 %v735_v7, %v734_v47  ;;  %v754_v20 = vadd.f32 %v753_v58, %v752_v55  ;;  %v772_v35 = vadd.f32 %v771_v8, %v770_v48  ;;  %v611_v8 = vld [vmem:[%s1253_s8 + $0x118] sm:$0xff] }
  0xf3   : > { %v790_v21 = vadd.f32 %v789_v17, %v788_v57  ;;  %v808_v36 = vadd.f32 %v807_v18, %v806_v0  ;;  %v826_v22 = vadd.f32 %v825_v14, %v824_v1  ;;  %v844_v23 = vadd.f32 %v843_v24, %v842_v2  ;;  %v587_v0 = vld [vmem:[%s1253_s8 + $0x58] sm:$0xff] }
  0xf4   : > { %v719_v30 = vrot.slane %v718_v15, 1  ;;  %v737_v31 = vrot.slane %v736_v34, 1  ;;  %v755_v41 = vrot.slane %v754_v20, 1  ;;  %v773_v42 = vrot.slane %v772_v35, 1  ;;  %v595_v1 = vld [vmem:[%s1253_s8 + $0x98] sm:$0xff] }
  0xf5   : > { %v791_v43 = vrot.slane %v790_v21, 1  ;;  %v809_v44 = vrot.slane %v808_v36, 1  ;;  %v827_v45 = vrot.slane %v826_v22, 1  ;;  %v845_v59 = vrot.slane %v844_v23, 1  ;;  %v603_v2 = vld [vmem:[%s1253_s8 + $0xd8] sm:$0xff] }
  0xf6   : > { %v720_v46 = vadd.f32 %v719_v30, %v718_v15  ;;  %v738_v32 = vadd.f32 %v737_v31, %v736_v34  ;;  %v756_v49 = vadd.f32 %v755_v41, %v754_v20  ;;  %v774_v33 = vadd.f32 %v773_v42, %v772_v35  ;;  %v619_v17 = vld [vmem:[%s1253_s8 + $0x158] sm:$0xff] }
  0xf7   : > { %v792_v51 = vadd.f32 %v791_v43, %v790_v21  ;;  %v810_v37 = vadd.f32 %v809_v44, %v808_v36  ;;  %v828_v52 = vadd.f32 %v827_v45, %v826_v22  ;;  %v846_v38 = vadd.f32 %v845_v59, %v844_v23  ;;  %v627_v18 = vld [vmem:[%s1253_s8 + $0x198] sm:$0xff] }
  0xf8   : > { %v868_v39 = vadd.f32 %v1269_v12, %v720_v46  ;;  %v870_v54 = vadd.f32 %v1269_v12, %v738_v32  ;;  %v872_v40 = vadd.f32 %v1269_v12, %v756_v49  ;;  %v874_v50 = vadd.f32 %v1269_v12, %v774_v33  ;;  %v635_v35 = vld [vmem:[%s1253_s8 + $0x1d8] sm:$0xff] }
  0xf9   : > { %v876_v47 = vadd.f32 %v1269_v12, %v792_v51  ;;  %v878_v55 = vadd.f32 %v1269_v12, %v810_v37  ;;  %v880_v48 = vadd.f32 %v1269_v12, %v828_v52  ;;  %v882_v57 = vadd.f32 %v1269_v12, %v846_v38  ;;  %v583_v59 = vld [vmem:[%s1253_s8 + $0x38] sm:$0xff] }
  0xfa   : > { %v900_v6 = vrot.slane %v870_v54, 7  ;;  %v903_v7 = vrot.slane %v872_v40, 6  ;;  %v906_v58 = vrot.slane %v874_v50, 5  ;;  %v651_v14 = vmul.f32 %v579_v53, %v1326_v60  ;;  %v591_v46 = vld [vmem:[%s1253_s8 + $0x78] sm:$0xff] }
  0xfb   : > { %v909_v24 = vrot.slane %v876_v47, 4  ;;  %v912_v15 = vrot.slane %v878_v55, 3  ;;  %v915_v34 = vrot.slane %v880_v48, 2  ;;  %v918_v20 = vrot.slane %v882_v57, 1  ;;  %v599_v32 = vld [vmem:[%s1253_s8 + $0xb8] sm:$0xff] }
  0xfc   : > { %v902_v12 = vsel %vm901_vm2, %v900_v6, %v868_v39  ;;  %v659_v21 = vmul.f32 %v587_v0, %v1326_v60  ;;  %v667_v36 = vmul.f32 %v595_v1, %v1326_v60  ;;  %v675_v22 = vmul.f32 %v603_v2, %v1326_v60  ;;  %v607_v52 = vld [vmem:[%s1253_s8 + $0xf8] sm:$0xff] }
  0xfd   : > { %v905_v23 = vsel %vm904_vm3, %v903_v7, %v902_v12  ;;  %v683_v30 = vmul.f32 %v611_v8, %v1326_v60  ;;  %v691_v31 = vmul.f32 %v619_v17, %v1326_v60  ;;  %v699_v41 = vmul.f32 %v627_v18, %v1326_v60  ;;  %v615_v38 = vld [vmem:[%s1253_s8 + $0x138] sm:$0xff] }
  0xfe   : > { %v908_v42 = vsel %vm907_vm4, %v906_v58, %v905_v23  ;;  %v707_v43 = vmul.f32 %v635_v35, %v1326_v60  ;;  %v721_v44 = vadd.f32 %v651_v14, %v1330_v56  ;;  %v739_v45 = vadd.f32 %v659_v21, %v1332_v61  ;;  %v623_v60 = vld [vmem:[%s1253_s8 + $0x178] sm:$0xff] }
  0xff   : > { %v911_v49 = vsel %vm910_vm5, %v909_v24, %v908_v42  ;;  %v757_v33 = vadd.f32 %v667_v36, %v1334_v62  ;;  %v775_v51 = vadd.f32 %v675_v22, %v1336_v63  ;;  %v793_v37 = vadd.f32 %v683_v30, %v1341_v3  ;;  %v631_v63 = vld [vmem:[%s1253_s8 + $0x1b8] sm:$0xff] }
 0x100   : > { %v914_v56 = vsel %vm913_vm6, %v912_v15, %v911_v49  ;;  %v811_v61 = vadd.f32 %v691_v31, %v1343_v28  ;;  %v829_v53 = vadd.f32 %v699_v41, %v1345_v4  ;;  %v847_v62 = vadd.f32 %v707_v43, %v1347_v5  ;;  %v639_v39 = vld [vmem:[%s1253_s8 + $0x1f8] sm:$0xff] }
 0x101   : > { %v917_v3 = vsel %vm916_vm7, %v915_v34, %v914_v56  ;;  %v655_v54 = vmul.f32 %v583_v59, %v1328_v19  ;;  %v663_v40 = vmul.f32 %v591_v46, %v1328_v19  ;;  %v671_v50 = vmul.f32 %v599_v32, %v1328_v19 }
 0x102   : > { %v920_v47 = vsel %vm919_vm8, %v918_v20, %v917_v3  ;;  %v679_v55 = vmul.f32 %v607_v52, %v1328_v19  ;;  %v687_v28 = vmul.f32 %v615_v38, %v1328_v19  ;;  %v695_v4 = vmul.f32 %v623_v60, %v1328_v19 }
 0x103   : > { %937 = vst [vmem:[%s1438_s11] sm:$0xff] %v920_v47  ;;  %v703_v5 = vmul.f32 %v631_v63, %v1328_v19  ;;  %v711_v48 = vmul.f32 %v639_v39, %v1328_v19  ;;  %v722_v57 = vadd.f32 %v721_v44, %v1352_v9  ;;  %v740_v0 = vadd.f32 %v739_v45, %v1354_v10 }
 0x104   : > { %v758_v1 = vadd.f32 %v757_v33, %v1356_v11  ;;  %v776_v2 = vadd.f32 %v775_v51, %v1358_v16  ;;  %v794_v6 = vadd.f32 %v793_v37, %v1363_v25  ;;  %v812_v7 = vadd.f32 %v811_v61, %v1365_v26 }
 0x105   : > { %v723_v58 = vadd.f32 %v722_v57, %v655_v54  ;;  %v741_v8 = vadd.f32 %v740_v0, %v663_v40  ;;  %v830_v17 = vadd.f32 %v829_v53, %v1367_v27  ;;  %v848_v18 = vadd.f32 %v847_v62, %v1369_v29 }
 0x106   : > { %v759_v14 = vadd.f32 %v758_v1, %v671_v50  ;;  %v777_v19 = vadd.f32 %v776_v2, %v679_v55  ;;  %v795_v24 = vadd.f32 %v794_v6, %v687_v28  ;;  %v813_v9 = vadd.f32 %v812_v7, %v695_v4 }
 0x107   : > { %v724_v15 = vrot.slane %v723_v58, 4  ;;  %v742_v10 = vrot.slane %v741_v8, 4  ;;  %v831_v34 = vadd.f32 %v830_v17, %v703_v5  ;;  %v849_v11 = vadd.f32 %v848_v18, %v711_v48 }
 0x108   : > { %v760_v20 = vrot.slane %v759_v14, 4  ;;  %v778_v16 = vrot.slane %v777_v19, 4  ;;  %v796_v35 = vrot.slane %v795_v24, 4  ;;  %v814_v25 = vrot.slane %v813_v9, 4 }
 0x109   : > { %v725_v12 = vadd.f32 %v724_v15, %v723_v58  ;;  %v743_v26 = vadd.f32 %v742_v10, %v741_v8  ;;  %v832_v21 = vrot.slane %v831_v34, 4  ;;  %v850_v36 = vrot.slane %v849_v11, 4 }
 0x10a   : > { %v761_v22 = vadd.f32 %v760_v20, %v759_v14  ;;  %v779_v27 = vadd.f32 %v778_v16, %v777_v19  ;;  %v797_v23 = vadd.f32 %v796_v35, %v795_v24  ;;  %v815_v29 = vadd.f32 %v814_v25, %v813_v9 }
 0x10b   : > { %v726_v30 = vrot.slane %v725_v12, 2  ;;  %v744_v31 = vrot.slane %v743_v26, 2  ;;  %v833_v41 = vadd.f32 %v832_v21, %v831_v34  ;;  %v851_v42 = vadd.f32 %v850_v36, %v849_v11 }
 0x10c   : > { %v762_v43 = vrot.slane %v761_v22, 2  ;;  %v780_v44 = vrot.slane %v779_v27, 2  ;;  %v798_v45 = vrot.slane %v797_v23, 2  ;;  %v816_v59 = vrot.slane %v815_v29, 2 }
 0x10d   : > { %v727_v46 = vadd.f32 %v726_v30, %v725_v12  ;;  %v745_v32 = vadd.f32 %v744_v31, %v743_v26  ;;  %v834_v49 = vrot.slane %v833_v41, 2  ;;  %v852_v33 = vrot.slane %v851_v42, 2 }
 0x10e   : > { %v763_v51 = vadd.f32 %v762_v43, %v761_v22  ;;  %v781_v37 = vadd.f32 %v780_v44, %v779_v27  ;;  %v799_v52 = vadd.f32 %v798_v45, %v797_v23  ;;  %v817_v38 = vadd.f32 %v816_v59, %v815_v29 }
 0x10f   : > { %v728_v60 = vrot.slane %v727_v46, 1  ;;  %v746_v56 = vrot.slane %v745_v32, 1  ;;  %v835_v61 = vadd.f32 %v834_v49, %v833_v41  ;;  %v853_v53 = vadd.f32 %v852_v33, %v851_v42 }
 0x110   : > { %v764_v62 = vrot.slane %v763_v51, 1  ;;  %v782_v63 = vrot.slane %v781_v37, 1  ;;  %v800_v39 = vrot.slane %v799_v52, 1  ;;  %v818_v3 = vrot.slane %v817_v38, 1 }
 0x111   : > { %v729_v54 = vadd.f32 %v728_v60, %v727_v46  ;;  %v747_v40 = vadd.f32 %v746_v56, %v745_v32  ;;  %v836_v50 = vrot.slane %v835_v61, 1  ;;  %v854_v47 = vrot.slane %v853_v53, 1 }
 0x112   : > { %v765_v55 = vadd.f32 %v764_v62, %v763_v51  ;;  %v783_v28 = vadd.f32 %v782_v63, %v781_v37  ;;  %v801_v4 = vadd.f32 %v800_v39, %v799_v52  ;;  %v819_v5 = vadd.f32 %v818_v3, %v817_v38 }
 0x113   : > { %v837_v48 = vadd.f32 %v836_v50, %v835_v61  ;;  %v855_v57 = vadd.f32 %v854_v47, %v853_v53  ;;  %v869_v0 = vadd.f32 %v1271_v13, %v729_v54  ;;  %v871_v1 = vadd.f32 %v1271_v13, %v747_v40 }
 0x114   : > { %v873_v2 = vadd.f32 %v1271_v13, %v765_v55  ;;  %v875_v6 = vadd.f32 %v1271_v13, %v783_v28  ;;  %v877_v7 = vadd.f32 %v1271_v13, %v801_v4  ;;  %v879_v58 = vadd.f32 %v1271_v13, %v819_v5 }
 0x115   : > { %v881_v8 = vadd.f32 %v1271_v13, %v837_v48  ;;  %v883_v17 = vadd.f32 %v1271_v13, %v855_v57  ;;  %v921_v18 = vrot.slane %v871_v1, 7 }
 0x116   : > { %v923_v14 = vrot.slane %v873_v2, 6  ;;  %v925_v24 = vrot.slane %v875_v6, 5  ;;  %v927_v15 = vrot.slane %v877_v7, 4  ;;  %v929_v34 = vrot.slane %v879_v58, 3 }
 0x117   : > { %v922_v19 = vsel %vm901_vm2, %v921_v18, %v869_v0  ;;  %v931_v20 = vrot.slane %v881_v8, 2  ;;  %v933_v35 = vrot.slane %v883_v17, 1 }
 0x118   : > { %v924_v9 = vsel %vm904_vm3, %v923_v14, %v922_v19 }
 0x119   : > { %v926_v10 = vsel %vm907_vm4, %v925_v24, %v924_v9 }
 0x11a   : > { %v928_v11 = vsel %vm910_vm5, %v927_v15, %v926_v10 }
 0x11b   : > { %v930_v16 = vsel %vm913_vm6, %v929_v34, %v928_v11 }
 0x11c   : > { %v932_v25 = vsel %vm916_vm7, %v931_v20, %v930_v16 }
 0x11d   : > { %v934_v13 = vsel %vm919_vm8, %v933_v35, %v932_v25 }
 0x11e   : > { %938 = vst [vmem:[%s1438_s11 + $0x8] sm:$0xff] %v934_v13 }
 0x11f PF: > { %s18_s25 = sadd.s32 1, %s1144_s25   ;;  %s1497_s23 = smov %s1140_s24 }
 0x120   : > { %p15_p5 = scmp.ge.s32.totalorder %s18_s25, 4   ;;  %s1498_s24 = smov %s1500_s5 }
 0x122   :  { %17 = sbr.rel (!%p15_p5) target bundleno = 3 (0x3), region = 81 }

</bundles_post_ra>
